<compile_context>
chip_gen: v6e
topology: v6e:2x2x1
jax: 0.10.0
libtpu: 0.0.40
codegen_flags: <defaults>
</compile_context>

<pallas_src>
import functools

import jax
import jax.numpy as jnp
from jax.experimental import pallas as pl
from jax.experimental.pallas import tpu as pltpu


def _round_up(a, b):
    return ((a + b - 1) // b) * b


def linear_kernel(x_ref, w_ref, b_ref, o_ref, acc_ref):
    """Computes one (tm, tn) output tile, accumulating over the K grid axis."""
    @pl.when(pl.program_id(2) == 0)
    def _():
        acc_ref[...] = jnp.zeros_like(acc_ref)

    acc_ref[...] += jnp.dot(
        x_ref[...], w_ref[...], preferred_element_type=jnp.float32)

    @pl.when(pl.program_id(2) == pl.num_programs(2) - 1)
    def _():
        o_ref[...] = (acc_ref[...] + b_ref[...]).astype(o_ref.dtype)


def _pick_tiles(batch, inplanes, num_classes):
    """Tile sizes: 128-multiples (MXU-friendly), bounded so that
    2 inputs x 2 buffers x tile + f32 accumulator stays well under the
    scoped-VMEM default on every generation (incl. v7x's 64 MiB physical)."""
    tm = min(256, _round_up(batch, 8))
    tn = min(512, _round_up(num_classes, 128))
    tk = min(512, _round_up(inplanes, 128))
    return tm, tn, tk


def prepare_linear_params(weight, bias, *, tn, tk, compute_dtype=jnp.bfloat16):
    """One-time prep of nn.Linear params: transpose to [K, N], pad to tile
    multiples, cast weight to the MXU compute dtype. Do this once, not per
    forward call (avoids re-paying an HBM pass on the weight every step)."""
    num_classes, inplanes = weight.shape
    kp = _round_up(inplanes, tk)
    np_ = _round_up(num_classes, tn)
    w_t = jnp.pad(weight.T.astype(compute_dtype),
                  ((0, kp - inplanes), (0, np_ - num_classes)))
    b2d = jnp.pad(bias.astype(jnp.float32),
                  (0, np_ - num_classes)).reshape(1, np_)
    return w_t, b2d


def linear_injector_forward(x, w_t, b2d, *, num_classes, tm, tn, tk,
                            compute_dtype=jnp.bfloat16,
                            inject=True, current_epoch=0, counter=0,
                            inject_index=0):
    """Forward of LinearInjector.

    x:    [B, inplanes] float32
    w_t:  [Kp, Np]      compute_dtype (from prepare_linear_params)
    b2d:  [1, Np]       float32       (from prepare_linear_params)
    """
    batch, inplanes = x.shape
    kp, np_ = w_t.shape
    mp = _round_up(batch, tm)

    # Pad + cast activations (fuses under jit; zero padding contributes zero).
    xp = jnp.pad(x.astype(compute_dtype),
                 ((0, mp - batch), (0, kp - inplanes)))

    grid = (mp // tm, np_ // tn, kp // tk)

    flops = 2 * mp * np_ * kp
    bytes_accessed = (mp * kp * xp.dtype.itemsize
                      + kp * np_ * w_t.dtype.itemsize
                      + np_ * 4
                      + mp * np_ * 4)

    out = pl.pallas_call(
        linear_kernel,
        out_shape=jax.ShapeDtypeStruct((mp, np_), jnp.float32),
        grid=grid,
        in_specs=[
            pl.BlockSpec((tm, tk), lambda i, j, k: (i, k)),
            pl.BlockSpec((tk, tn), lambda i, j, k: (k, j)),
            pl.BlockSpec((1, tn), lambda i, j, k: (0, j)),
        ],
        out_specs=pl.BlockSpec((tm, tn), lambda i, j, k: (i, j)),
        scratch_shapes=[pltpu.VMEM((tm, tn), jnp.float32)],
        compiler_params=pltpu.CompilerParams(
            dimension_semantics=("parallel", "parallel", "arbitrary"),
            vmem_limit_bytes=32 * 1024 * 1024),
        cost_estimate=pl.CostEstimate(
            flops=flops, transcendentals=0, bytes_accessed=bytes_accessed),
    )(xp, w_t, b2d)

    # Slice off padding; lane-dense padded slab was only for the kernel.
    out = out[:batch, :num_classes].astype(x.dtype)

    if counter == inject_index:
        # TODO(synk): HansGruberNI error-injection semantics are not defined in
        # the reference snippet; its no-inject path is the identity, which is
        # what we reproduce here (would be wired through SMEM scalar prefetch
        # + pl.when if/when the error model is specified).
        out = out
    return out


if __name__ == "__main__":
    key = jax.random.PRNGKey(0)
    kx, kw, kb = jax.random.split(key, 3)

    B = 8             # batch
    inplanes = 32     # input features
    num_classes = 16  # output classes

    x = jax.random.normal(kx, (B, inplanes), dtype=jnp.float32)
    # Deterministic parameter init (kaiming-uniform-ish scale like nn.Linear).
    bound = 1.0 / (inplanes ** 0.5)
    weight = jax.random.uniform(kw, (num_classes, inplanes), dtype=jnp.float32,
                                minval=-bound, maxval=bound)
    bias = jax.random.uniform(kb, (num_classes,), dtype=jnp.float32,
                              minval=-bound, maxval=bound)

    tm, tn, tk = _pick_tiles(B, inplanes, num_classes)
    # One-time parameter prep (transpose + pad + bf16 cast), outside forward.
    w_t, b2d = prepare_linear_params(weight, bias, tn=tn, tk=tk)

    fwd = jax.jit(functools.partial(
        linear_injector_forward,
        num_classes=num_classes, tm=tm, tn=tn, tk=tk))

    out = fwd(x, w_t, b2d)
    out = jax.block_until_ready(out)

    # Reference check against plain JAX (f32 reference; bf16 inputs on MXU).
    ref = x @ weight.T + bias
    assert out.shape == (B, num_classes)
    assert jnp.allclose(out, ref, atol=2e-2, rtol=2e-2), "mismatch vs reference"

    print("KERNEL_OK")
</pallas_src>

<mosaic_0001>
module attributes {stable_mosaic.version = 11 : i64} {
  func.func @linear_kernel(%arg0: i32, %arg1: i32, %arg2: i32, %arg3: memref<8x128xbf16, #tpu.memory_space<vmem>>, %arg4: memref<128x128xbf16, #tpu.memory_space<vmem>>, %arg5: memref<1x128xf32, #tpu.memory_space<vmem>>, %arg6: memref<8x128xf32, #tpu.memory_space<vmem>>, %arg7: memref<8x128xf32, #tpu.memory_space<vmem>>) attributes {dimension_semantics = [#tpu.dimension_semantics<parallel>, #tpu.dimension_semantics<parallel>, #tpu.dimension_semantics<arbitrary>], iteration_bounds = array<i64: 1, 1, 1>, scalar_prefetch = 0 : i64, scratch_operands = 1 : i64, tpu.core_type = #tpu.core_type<tc>, window_params = [{transform_indices = @transform_0, window_bounds = array<i64: 8, 128>}, {transform_indices = @transform_1, window_bounds = array<i64: 128, 128>}, {transform_indices = @transform_2, window_bounds = array<i64: 1, 128>}, {transform_indices = @transform_3, window_bounds = array<i64: 8, 128>}]} {
    %c0_i32 = arith.constant 0 : i32
    %0 = arith.cmpi eq, %arg2, %c0_i32 : i32
    %1 = arith.extui %0 : i1 to i32
    %c0_i32_0 = arith.constant 0 : i32
    %2 = arith.cmpi ne, %1, %c0_i32_0 : i32
    scf.if %2 {
      %cst_10 = arith.constant 0.000000e+00 : f32
      %12 = vector.broadcast %cst_10 : f32 to vector<8x128xf32>
      %c0_11 = arith.constant 0 : index
      %c0_12 = arith.constant 0 : index
      %13 = vector.load %arg7[%c0_11, %c0_12] : memref<8x128xf32, #tpu.memory_space<vmem>>, vector<8x128xf32>
      tpu.vector_store %arg7[%c0_11, %c0_12], %12 {strides = array<i32>} : memref<8x128xf32, #tpu.memory_space<vmem>>, vector<8x128xf32>,
    } else {
    }
    %c0 = arith.constant 0 : index
    %c0_1 = arith.constant 0 : index
    %3 = vector.load %arg7[%c0, %c0_1] : memref<8x128xf32, #tpu.memory_space<vmem>>, vector<8x128xf32>
    %c0_2 = arith.constant 0 : index
    %c0_3 = arith.constant 0 : index
    %4 = vector.load %arg3[%c0_2, %c0_3] : memref<8x128xbf16, #tpu.memory_space<vmem>>, vector<8x128xbf16>
    %c0_4 = arith.constant 0 : index
    %c0_5 = arith.constant 0 : index
    %5 = vector.load %arg4[%c0_4, %c0_5] : memref<128x128xbf16, #tpu.memory_space<vmem>>, vector<128x128xbf16>
    %cst = arith.constant dense<0.000000e+00> : vector<8x128xf32>
    %6 = tpu.matmul %4, %5, %cst {dimension_numbers = #tpu.dot_dimension_numbers<[1], [0], [0], [1], [0, 0, 1, 1], [], []>} : vector<8x128xbf16>, vector<128x128xbf16>, vector<8x128xf32> -> vector<8x128xf32>
    %7 = arith.addf %3, %6 : vector<8x128xf32>
    %c0_6 = arith.constant 0 : index
    %c0_7 = arith.constant 0 : index
    %8 = vector.load %arg7[%c0_6, %c0_7] : memref<8x128xf32, #tpu.memory_space<vmem>>, vector<8x128xf32>
    tpu.vector_store %arg7[%c0_6, %c0_7], %7 {strides = array<i32>} : memref<8x128xf32, #tpu.memory_space<vmem>>, vector<8x128xf32>,
    %c0_i32_8 = arith.constant 0 : i32
    %9 = arith.cmpi eq, %arg2, %c0_i32_8 : i32
    %10 = arith.extui %9 : i1 to i32
    %c0_i32_9 = arith.constant 0 : i32
    %11 = arith.cmpi ne, %10, %c0_i32_9 : i32
    scf.if %11 {
      %c0_10 = arith.constant 0 : index
      %c0_11 = arith.constant 0 : index
      %12 = vector.load %arg7[%c0_10, %c0_11] : memref<8x128xf32, #tpu.memory_space<vmem>>, vector<8x128xf32>
      %c0_12 = arith.constant 0 : index
      %c0_13 = arith.constant 0 : index
      %13 = vector.load %arg5[%c0_12, %c0_13] : memref<1x128xf32, #tpu.memory_space<vmem>>, vector<1x128xf32>
      %14 = vector.broadcast %13 : vector<1x128xf32> to vector<8x128xf32>
      %15 = arith.addf %12, %14 : vector<8x128xf32>
      %c0_14 = arith.constant 0 : index
      %c0_15 = arith.constant 0 : index
      %16 = vector.load %arg6[%c0_14, %c0_15] : memref<8x128xf32, #tpu.memory_space<vmem>>, vector<8x128xf32>
      tpu.vector_store %arg6[%c0_14, %c0_15], %15 {strides = array<i32>} : memref<8x128xf32, #tpu.memory_space<vmem>>, vector<8x128xf32>,
    } else {
    }
    return
  }
  func.func @transform_0(%arg0: i32, %arg1: i32, %arg2: i32) -> (i32, i32) {
    %c0_i32 = arith.constant 0 : i32
    return %arg0, %arg2 : i32, i32
  }
  func.func @transform_1(%arg0: i32, %arg1: i32, %arg2: i32) -> (i32, i32) {
    %c0_i32 = arith.constant 0 : i32
    return %arg2, %arg1 : i32, i32
  }
  func.func @transform_2(%arg0: i32, %arg1: i32, %arg2: i32) -> (i32, i32) {
    %c0_i32 = arith.constant 0 : i32
    %c0_i32_0 = arith.constant 0 : i32
    return %c0_i32, %arg1 : i32, i32
  }
  func.func @transform_3(%arg0: i32, %arg1: i32, %arg2: i32) -> (i32, i32) {
    %c0_i32 = arith.constant 0 : i32
    return %arg0, %arg1 : i32, i32
  }
}

</mosaic_0001>

<bundles_post_ra>
// kernel: linear_injector_forward.1
= control target key start
LH: loop header
LB: loop body
LE: loop exit
PB: predicated region body
PF: predicated region fallthrough
CT: control target
= control target key end

     0   :  { %8 = vsyncpa [#allocation4], 0  ;;  %s305_s0 = inlined_call_operand.vmem [shape: bf16[8,128], index: 0, kind: input, shape index: {}]   ;;  %s306_s1 = inlined_call_operand.hbm [shape: bf16[128,128], index: 1, kind: input, shape index: {}]   ;;  %s307_s2 = inlined_call_operand.vmem [shape: f32[1,128], index: 2, kind: input, shape index: {}]   ;;  %s308_s3 = inlined_call_operand.hbm [shape: f32[8,128], index: 3, kind: output, shape index: {}]  }
   0x1   :  { %9 = vsyncpa [#allocation5], 0  ;;  %s267_s12 = smov [#allocation3]  }
   0x2   :  { %s17_s13 = sshll.u32 %s267_s12, 4  ;;  %s18_s13 = int_to_ptr.vmem [resolvable:$true] %s17_s13 }
   0x3   :  { %s231_s14 = scalar_lea.vmem %s18_s13, 1024  ;;  %p236_p1 = scmp.lt.s32.totalorder %s18_s13, %s18_s13 }
   0x4   :  { %p232_p0 = scmp.ne.s32.totalorder %s18_s13, %s231_s14  ;;  %p237_p2 = scmp.lt.s32.totalorder %s231_s14, %s231_s14 }
   0x6   :  { %p238_p3 = por %p237_p2, %p236_p1 }
   0x8   :  { %p239_p4 = pnand %p238_p3, %p232_p0 }
   0xa   :  { %242 = shalt.err (!%p239_p4)
}
   0xb   :  { %s268_s15 = smov 64   ;;  %s269_s16 = smov 4  }
   0xc   :  { %23 = dma.hbm_to_vmem [thread:$0]  %s306_s1, 1024, %s18_s13, [#allocation4], %s268_s15, %s268_s15, %s269_s16  }
   0xd   :  { %263 = dma.done.wait [#allocation4], 1024  }
   0xe   :  { %264 = vsyncadd [#allocation4], 4294966272  ;;  %v270_v0 = vmov 0.0   ;;  %vm271_vm0 = vmmov 0   ;;  %v215_v1 = vld [vmem:[#allocation3 + $0x38] sm:$0xff]   ;;  %v216_v2 = vld [vmem:[#allocation3 + $0x30] sm:$0xff]  }
   0xf   :  { %189 = vmatprep.subr.bf16.mxu0 %v270_v0  ;;  %205 = vmatprep.mubr.msk.bf16.mxu0 %vm271_vm0, %v270_v0  ;;  %v217_v3 = vld [vmem:[#allocation3 + $0x28] sm:$0xff]   ;;  %v218_v4 = vld [vmem:[#allocation3 + $0x20] sm:$0xff]   ;;  %v219_v5 = vld [vmem:[#allocation3 + $0x18] sm:$0xff]   ;;  %s272_s22 = smov [#allocation6]  }
  0x10   :  { %190 = vmatpush3.bf16.msra.mxu0 %v215_v1  ;;  %v220_v6 = vld [vmem:[#allocation3 + $0x10] sm:$0xff]   ;;  %v221_v7 = vld [vmem:[#allocation3 + $0x8] sm:$0xff]   ;;  %v222_v8 = vld [vmem:[#allocation3] sm:$0xff]   ;;  %s162_s23 = sshll.u32 %s272_s22, 4  ;;  %s163_s23 = int_to_ptr.vmem [resolvable:$true] %s162_s23 }
  0x11   :  { %191 = vmatprep.subr.bf16.mxu0 %v270_v0  ;;  %v36_v9 = vld [vmem:[%s305_s0] sm:$0xf]  ;;  %s243_s24 = scalar_lea.vmem %s163_s23, 128  ;;  %p248_p6 = scmp.lt.s32.totalorder %s163_s23, %s163_s23 }
  0x12   :  { %v179_v10 = vld [vmem:[%s307_s2] ss:$0 sm:$0xff]  ;;  %p244_p5 = scmp.ne.s32.totalorder %s163_s23, %s243_s24  ;;  %p249_p7 = scmp.lt.s32.totalorder %s243_s24, %s243_s24 }
  0x14   :  { %192 = vmatpush3.bf16.msra.mxu0 %v216_v2  ;;  %p250_p8 = por %p249_p7, %p248_p6 }
  0x15   :  { %193 = vmatprep.subr.bf16.mxu0 %v270_v0 }
  0x16   :  { %p251_p9 = pnand %p250_p8, %p244_p5 }
  0x18   :  { %194 = vmatpush3.bf16.msra.mxu0 %v217_v3 }
  0x19   :  { %195 = vmatprep.subr.bf16.mxu0 %v270_v0 }
  0x1c   :  { %196 = vmatpush3.bf16.msra.mxu0 %v218_v4 }
  0x1d   :  { %197 = vmatprep.subr.bf16.mxu0 %v270_v0 }
  0x20   :  { %198 = vmatpush3.bf16.msra.mxu0 %v219_v5 }
  0x21   :  { %199 = vmatprep.subr.bf16.mxu0 %v270_v0 }
  0x24   :  { %200 = vmatpush3.bf16.msra.mxu0 %v220_v6 }
  0x25   :  { %201 = vmatprep.subr.bf16.mxu0 %v270_v0 }
  0x28   :  { %202 = vmatpush3.bf16.msra.mxu0 %v221_v7 }
  0x29   :  { %203 = vmatprep.subr.bf16.mxu0 %v270_v0 }
  0x2c   :  { %204 = vmatpush3.bf16.msra.mxu0 %v222_v8 }
  0x2f   :  { %206 = vmatmul.mubr.bf16.vlgmr.msra.gmra.mxu0 %v36_v9 }
  0xef   :  { %v135_v11 = vpop.f32.mrf.mxu0 }
  0xf0   :  { %v154_v12 = vadd.f32 %v179_v10, %v135_v11 }
  0xf1   :  { %v207_v13 = vpop.f32.mrf.mxu0 }
  0xf2   :  { %155 = vst [vmem:[#allocation6] sm:$0xff] %v154_v12 }
  0xf3   :  { %v138_v14 = vpop.f32.mrf.mxu0 }
  0xf4   :  { %254 = shalt.err (!%p251_p9)
}
  0xf5   :  { %165 = dma.vmem_to_hbm [thread:$0]  %s163_s23, 128, %s308_s3, [#allocation5]   ;;  %v208_v15 = vpop.f32.mrf.mxu0 }
  0xf6   :  { %265 = dma.done.wait [#allocation5], 128  }
  0xf7   :  { %266 = vsyncadd [#allocation5], 4294967168 }
  0xf8   :  { %169 = vsyncpa [#allocation4], 1 }
  0xf9   :  { %170 = vsyncpa [#allocation5], 1 }

</bundles_post_ra>
